<compile_context>
chip_gen: v7x
topology: tpu7x:2x2x1
jax: 0.10.0
libtpu: 0.0.40
codegen_flags: <defaults>
</compile_context>

<pallas_src>
import functools

import jax
import jax.numpy as jnp
from jax import lax
from jax.experimental import pallas as pl
from jax.experimental.pallas import tpu as pltpu


NUM_LAYERS = 3  # number of dense+ReLU layers in the DAN encoder


def _cdiv(a: int, b: int) -> int:
    return (a + b - 1) // b


def _round_up(a: int, b: int) -> int:
    return _cdiv(a, b) * b


@functools.lru_cache(maxsize=1)
def _vmem_capacity_bytes() -> int:
    """Per-core VMEM capacity; conservative 64 MiB (v7x) default if query fails."""
    try:
        cap = int(getattr(pltpu.get_tpu_info(), "vmem_capacity_bytes", 0))
        if cap > 0:
            return cap
    except Exception:  # pragma: no cover - defensive
        pass
    return 64 * 1024 * 1024


def _plan(B: int, T: int, D: int, x_itemsize: int, L: int):
    """Pick (B_t, T_t, vmem_limit_bytes) from the shapes and the chip's VMEM size."""
    f32 = 4
    # Token tile: full T when small (full-extent block, any alignment legal),
    # otherwise 128 (keeps the (B_t, T_t) mask block's lane dim 128-aligned).
    T_t = T if T <= 128 else 128

    # VMEM footprint model (padded to the (8, 128) native tiling).
    Dp = _round_up(D, 128)
    T8 = _round_up(T_t, 8)
    Tl = _round_up(T_t, 128)
    L8 = _round_up(L, 8)
    fixed = 2 * L * _round_up(D, 8) * Dp * f32 + 2 * L8 * Dp * f32   # weights+biases (2 bufs)
    per_row = (2 * T8 * Dp * x_itemsize        # x tile, double-buffered
               + 2 * Tl * f32                  # mask tile, double-buffered
               + 2 * Dp * f32                  # combined_vector block
               + 2 * L8 * Dp * f32             # layer_representations block
               + (Dp + 128) * f32)             # scratch accumulators

    cap = _vmem_capacity_bytes()
    budget = int(cap * 0.7)                    # leave headroom (v7x: ~45 MiB, v5e/v6e: ~90 MiB)
    bt_max = max(8, ((budget - fixed) // max(per_row, 1)) // 8 * 8)
    bt_max = min(bt_max, 512)

    if B <= 8:
        B_t = B                                # full-extent batch block (any B legal)
    else:
        nb = max(1, _cdiv(B, bt_max))
        B_t = _round_up(_cdiv(B, nb), 8)       # balanced tiles -> minimal edge waste
        B_t = max(8, min(B_t, (B // 8) * 8))   # keep the block inside the array
        if _cdiv(B, B_t) == 1 and B >= 16:     # >= 2 "parallel" steps (v7x megacore)
            B_t = max(8, min(_round_up(_cdiv(B, 2), 8), (B // 8) * 8))

    est = fixed + B_t * per_row
    vmem_limit = int(min(0.9 * cap, max(1.4 * est, 32 * 1024 * 1024)))
    return B_t, T_t, vmem_limit


def _make_dan_kernel(num_layers: int, T_total: int, T_t: int, t_chunk: int,
                     need_t_mask: bool):
    """Kernel factory closing over static shape/config parameters."""
    n_chunks = T_t // t_chunk

    def kernel(x_ref, mask_ref, w_ref, b_ref, comb_ref, reps_ref, acc_ref, cnt_ref):
        # x_ref    : (B_t, T_t, D)  input dtype   token-embedding tile
        # mask_ref : (B_t, T_t)     f32           1.0 real token / 0.0 padding
        # w_ref    : (L, D, D)      f32           VMEM-resident layer weights
        # b_ref    : (L, D)         f32           VMEM-resident layer biases
        # comb_ref : (B_t, D)       f32           combined_vector tile
        # reps_ref : (B_t, L, D)    f32           layer representations
        # acc_ref  : (B_t, D)       f32           running masked sum over tokens
        # cnt_ref  : (B_t, 1)       f32           running token count
        ti = pl.program_id(1)

        @pl.when(ti == 0)
        def _init():
            acc_ref[...] = jnp.zeros_like(acc_ref)
            cnt_ref[...] = jnp.zeros_like(cnt_ref)

        # Chunked multiply-accumulate over the token axis (8-sublane chunks) so the
        # (B_t, T_t, D) product never materializes in VMEM.
        part = jnp.zeros(acc_ref.shape, jnp.float32)
        cnt = jnp.zeros(cnt_ref.shape, jnp.float32)
        for c in range(n_chunks):                              # static, short
            lo = c * t_chunk
            xs = x_ref[:, lo:lo + t_chunk, :].astype(jnp.float32)   # (B_t, tc, D)
            ms = mask_ref[:, lo:lo + t_chunk].astype(jnp.float32)   # (B_t, tc)
            if need_t_mask:
                # cdiv grid: mask out the out-of-bounds tail of the last token tile
                # (its VMEM contents are stale, never rely on them being zero).
                tok = (ti * T_t + lo
                       + lax.broadcasted_iota(jnp.int32, (1, t_chunk), 1))
                valid = tok < T_total
                ms = jnp.where(valid, ms, 0.0)
                xs = jnp.where(valid[:, :, None], xs, 0.0)
            part = part + jnp.sum(xs * ms[:, :, None], axis=1)
            cnt = cnt + jnp.sum(ms, axis=1, keepdims=True)
        acc_ref[...] += part
        cnt_ref[...] += cnt

        @pl.when(ti == pl.num_programs(1) - 1)
        def _finalize():
            denom = jnp.maximum(cnt_ref[...], 1.0)             # div-by-zero guard
            h = acc_ref[...] / denom                           # exact mean (off hot path)
            for l in range(num_layers):                        # static, short: unrolled
                h = jnp.dot(h, w_ref[l], preferred_element_type=jnp.float32)
                h = jnp.maximum(h + b_ref[l][None, :], 0.0)    # ReLU
                reps_ref[:, l:l + 1, :] = h[:, None, :]        # direct (B, L, D) layout
            comb_ref[...] = h

    return kernel


@jax.jit
def sequence_to_vector(vector_sequence, sequence_mask, weights, biases):
    """DAN SequenceToVector forward pass.

    vector_sequence : (B, T, D) float (f32 or bf16; read in native dtype)
    sequence_mask   : (B, T)    float/bool (1 = real token, 0 = padding)
    weights         : (L, D, D) float  (applied as h @ W)
    biases          : (L, D)    float

    Returns dict with:
      combined_vector       : (B, D)    float32
      layer_representations : (B, L, D) float32
    """
    B, T, D = vector_sequence.shape
    L = weights.shape[0]

    x = vector_sequence                                  # no pad, no cast: read as-is
    m = sequence_mask.astype(jnp.float32)                # tiny (B, T) cast
    w = weights.astype(jnp.float32)
    b = biases.astype(jnp.float32)

    B_t, T_t, vmem_limit = _plan(B, T, D, x.dtype.itemsize, L)
    t_chunk = 8 if T_t % 8 == 0 else T_t
    need_t_mask = (T % T_t) != 0
    grid = (_cdiv(B, B_t), _cdiv(T, T_t))

    kernel = _make_dan_kernel(L, T, T_t, t_chunk, need_t_mask)

    comb, reps = pl.pallas_call(
        kernel,
        out_shape=(
            jax.ShapeDtypeStruct((B, D), jnp.float32),       # combined_vector
            jax.ShapeDtypeStruct((B, L, D), jnp.float32),    # layer_representations
        ),
        grid_spec=pltpu.PrefetchScalarGridSpec(
            num_scalar_prefetch=0,
            grid=grid,
            in_specs=[
                pl.BlockSpec((B_t, T_t, D), lambda bi, ti: (bi, ti, 0)),
                pl.BlockSpec((B_t, T_t), lambda bi, ti: (bi, ti)),
                # Constant index_map -> weights/biases stay resident in VMEM.
                pl.BlockSpec((L, D, D), lambda bi, ti: (0, 0, 0)),
                pl.BlockSpec((L, D), lambda bi, ti: (0, 0)),
            ],
            out_specs=(
                pl.BlockSpec((B_t, D), lambda bi, ti: (bi, 0)),
                pl.BlockSpec((B_t, L, D), lambda bi, ti: (bi, 0, 0)),
            ),
            scratch_shapes=[
                pltpu.VMEM((B_t, D), jnp.float32),   # pooled-sum accumulator
                pltpu.VMEM((B_t, 1), jnp.float32),   # token-count accumulator
            ],
        ),
        compiler_params=pltpu.CompilerParams(
            dimension_semantics=("parallel", "arbitrary"),
            vmem_limit_bytes=vmem_limit,
        ),
    )(x, m, w, b)

    return {"combined_vector": comb, "layer_representations": reps}


def _reference(vector_sequence, sequence_mask, weights, biases):
    """Pure-JAX reference for a correctness check."""
    m = sequence_mask.astype(jnp.float32)
    masked = vector_sequence.astype(jnp.float32) * m[:, :, None]
    denom = jnp.maximum(jnp.sum(m, axis=1, keepdims=True), 1.0)
    h = jnp.sum(masked, axis=1) / denom
    reps = []
    for l in range(weights.shape[0]):
        h = jnp.maximum(h @ weights[l] + biases[l], 0.0)
        reps.append(h)
    return h, jnp.stack(reps, axis=1)


def _run_case(key, B, T, D, L):
    k_x, k_w, k_b, k_len = jax.random.split(key, 4)
    x = jax.random.normal(k_x, (B, T, D), dtype=jnp.float32)
    lengths = jax.random.randint(k_len, (B,), 1, T + 1)
    mask = (jnp.arange(T)[None, :] < lengths[:, None]).astype(jnp.float32)
    w = 0.1 * jax.random.normal(k_w, (L, D, D), dtype=jnp.float32)
    b = 0.01 * jax.random.normal(k_b, (L, D), dtype=jnp.float32)

    out = sequence_to_vector(x, mask, w, b)
    comb = jax.block_until_ready(out["combined_vector"])
    reps = jax.block_until_ready(out["layer_representations"])

    ref_comb, ref_reps = _reference(x, mask, w, b)
    assert comb.shape == (B, D)
    assert reps.shape == (B, L, D)
    assert jnp.allclose(comb, ref_comb, atol=1e-4, rtol=1e-4), "combined mismatch"
    assert jnp.allclose(reps, ref_reps, atol=1e-4, rtol=1e-4), "reps mismatch"


if __name__ == "__main__":
    key = jax.random.PRNGKey(0)
    k1, k2 = jax.random.split(key)
    # Small canonical case (single token tile, single batch tile).
    _run_case(k1, B=2, T=8, D=32, L=NUM_LAYERS)
    # Multi-tile case: T=160 exercises the token-axis accumulator + in-kernel
    # remainder masking; B=12 exercises a partial batch block and a 2-step
    # "parallel" axis.
    _run_case(k2, B=12, T=160, D=64, L=NUM_LAYERS)
    print("KERNEL_OK")
</pallas_src>

<mosaic_0001>
module attributes {stable_mosaic.version = 11 : i64} {
  func.func @kernel(%arg0: i32, %arg1: i32, %arg2: memref<2x8x32xf32, #tpu.memory_space<vmem>>, %arg3: memref<2x8xf32, #tpu.memory_space<vmem>>, %arg4: memref<3x32x32xf32, #tpu.memory_space<vmem>>, %arg5: memref<3x32xf32, #tpu.memory_space<vmem>>, %arg6: memref<2x32xf32, #tpu.memory_space<vmem>>, %arg7: memref<2x3x32xf32, #tpu.memory_space<vmem>>, %arg8: memref<2x32xf32, #tpu.memory_space<vmem>>, %arg9: memref<2x1xf32, #tpu.memory_space<vmem>>) attributes {dimension_semantics = [#tpu.dimension_semantics<parallel>, #tpu.dimension_semantics<arbitrary>], iteration_bounds = array<i64: 1, 1>, scalar_prefetch = 0 : i64, scratch_operands = 2 : i64, tpu.core_type = #tpu.core_type<tc>, window_params = [{transform_indices = @transform_0, window_bounds = array<i64: 2, 8, 32>}, {transform_indices = @transform_1, window_bounds = array<i64: 2, 8>}, {pipeline_mode = #tpu.pipeline_mode<synchronous>, transform_indices = @transform_2, window_bounds = array<i64: 3, 32, 32>}, {pipeline_mode = #tpu.pipeline_mode<synchronous>, transform_indices = @transform_3, window_bounds = array<i64: 3, 32>}, {transform_indices = @transform_4, window_bounds = array<i64: 2, 32>}, {transform_indices = @transform_5, window_bounds = array<i64: 2, 3, 32>}]} {
    %c0_i32 = arith.constant 0 : i32
    %0 = arith.cmpi eq, %arg1, %c0_i32 : i32
    %1 = arith.extui %0 : i1 to i32
    %c0_i32_0 = arith.constant 0 : i32
    %2 = arith.cmpi ne, %1, %c0_i32_0 : i32
    scf.if %2 {
      %cst_18 = arith.constant 0.000000e+00 : f32
      %24 = vector.broadcast %cst_18 : f32 to vector<2x32xf32>
      %c0_19 = arith.constant 0 : index
      %c0_20 = arith.constant 0 : index
      %25 = vector.load %arg8[%c0_19, %c0_20] : memref<2x32xf32, #tpu.memory_space<vmem>>, vector<2x32xf32>
      tpu.vector_store %arg8[%c0_19, %c0_20], %24 {strides = array<i32>} : memref<2x32xf32, #tpu.memory_space<vmem>>, vector<2x32xf32>,
      %cst_21 = arith.constant 0.000000e+00 : f32
      %26 = vector.broadcast %cst_21 : f32 to vector<2x1xf32>
      %c0_22 = arith.constant 0 : index
      %c0_23 = arith.constant 0 : index
      %27 = vector.load %arg9[%c0_22, %c0_23] : memref<2x1xf32, #tpu.memory_space<vmem>>, vector<2x1xf32>
      tpu.vector_store %arg9[%c0_22, %c0_23], %26 {strides = array<i32>} : memref<2x1xf32, #tpu.memory_space<vmem>>, vector<2x1xf32>,
    } else {
    }
    %cst = arith.constant 0.000000e+00 : f32
    %3 = vector.broadcast %cst : f32 to vector<2x32xf32>
    %cst_1 = arith.constant 0.000000e+00 : f32
    %4 = vector.broadcast %cst_1 : f32 to vector<2x1xf32>
    %c0 = arith.constant 0 : index
    %c0_2 = arith.constant 0 : index
    %c0_3 = arith.constant 0 : index
    %5 = vector.load %arg2[%c0, %c0_2, %c0_3] : memref<2x8x32xf32, #tpu.memory_space<vmem>>, vector<2x8x32xf32>
    %c0_4 = arith.constant 0 : index
    %c0_5 = arith.constant 0 : index
    %6 = vector.load %arg3[%c0_4, %c0_5] : memref<2x8xf32, #tpu.memory_space<vmem>>, vector<2x8xf32>
    %7 = vector.shape_cast %6 : vector<2x8xf32> to vector<2x8x1xf32>
    %8 = vector.broadcast %7 : vector<2x8x1xf32> to vector<2x8x32xf32>
    %9 = arith.mulf %5, %8 : vector<2x8x32xf32>
    %cst_6 = arith.constant dense<0.000000e+00> : vector<2x32xf32>
    %10 = vector.multi_reduction <add>, %9, %cst_6 [1] : vector<2x8x32xf32> to vector<2x32xf32>
    %11 = arith.addf %3, %10 : vector<2x32xf32>
    %cst_7 = arith.constant dense<0.000000e+00> : vector<2xf32>
    %12 = vector.multi_reduction <add>, %6, %cst_7 [1] : vector<2x8xf32> to vector<2xf32>
    %13 = vector.shape_cast %12 : vector<2xf32> to vector<2x1xf32>
    %14 = arith.addf %4, %13 : vector<2x1xf32>
    %c0_8 = arith.constant 0 : index
    %c0_9 = arith.constant 0 : index
    %15 = vector.load %arg8[%c0_8, %c0_9] : memref<2x32xf32, #tpu.memory_space<vmem>>, vector<2x32xf32>
    %16 = arith.addf %15, %11 : vector<2x32xf32>
    %c0_10 = arith.constant 0 : index
    %c0_11 = arith.constant 0 : index
    %17 = vector.load %arg8[%c0_10, %c0_11] : memref<2x32xf32, #tpu.memory_space<vmem>>, vector<2x32xf32>
    tpu.vector_store %arg8[%c0_10, %c0_11], %16 {strides = array<i32>} : memref<2x32xf32, #tpu.memory_space<vmem>>, vector<2x32xf32>,
    %c0_12 = arith.constant 0 : index
    %c0_13 = arith.constant 0 : index
    %18 = vector.load %arg9[%c0_12, %c0_13] : memref<2x1xf32, #tpu.memory_space<vmem>>, vector<2x1xf32>
    %19 = arith.addf %18, %14 : vector<2x1xf32>
    %c0_14 = arith.constant 0 : index
    %c0_15 = arith.constant 0 : index
    %20 = vector.load %arg9[%c0_14, %c0_15] : memref<2x1xf32, #tpu.memory_space<vmem>>, vector<2x1xf32>
    tpu.vector_store %arg9[%c0_14, %c0_15], %19 {strides = array<i32>} : memref<2x1xf32, #tpu.memory_space<vmem>>, vector<2x1xf32>,
    %c0_i32_16 = arith.constant 0 : i32
    %21 = arith.cmpi eq, %arg1, %c0_i32_16 : i32
    %22 = arith.extui %21 : i1 to i32
    %c0_i32_17 = arith.constant 0 : i32
    %23 = arith.cmpi ne, %22, %c0_i32_17 : i32
    scf.if %23 {
      %c0_18 = arith.constant 0 : index
      %c0_19 = arith.constant 0 : index
      %24 = vector.load %arg9[%c0_18, %c0_19] : memref<2x1xf32, #tpu.memory_space<vmem>>, vector<2x1xf32>
      %cst_20 = arith.constant 1.000000e+00 : f32
      %25 = vector.broadcast %cst_20 : f32 to vector<2x1xf32>
      %26 = arith.maximumf %24, %25 : vector<2x1xf32>
      %c0_21 = arith.constant 0 : index
      %c0_22 = arith.constant 0 : index
      %27 = vector.load %arg8[%c0_21, %c0_22] : memref<2x32xf32, #tpu.memory_space<vmem>>, vector<2x32xf32>
      %28 = vector.broadcast %26 : vector<2x1xf32> to vector<2x32xf32>
      %29 = arith.divf %27, %28 : vector<2x32xf32>
      %c0_23 = arith.constant 0 : index
      %c0_24 = arith.constant 0 : index
      %c0_25 = arith.constant 0 : index
      %30 = vector.load %arg4[%c0_23, %c0_24, %c0_25] : memref<3x32x32xf32, #tpu.memory_space<vmem>>, vector<1x32x32xf32>
      %31 = vector.shape_cast %30 : vector<1x32x32xf32> to vector<32x32xf32>
      %cst_26 = arith.constant dense<0.000000e+00> : vector<2x32xf32>
      %32 = tpu.matmul %29, %31, %cst_26 {dimension_numbers = #tpu.dot_dimension_numbers<[1], [0], [0], [1], [0, 0, 1, 1], [], []>} : vector<2x32xf32>, vector<32x32xf32>, vector<2x32xf32> -> vector<2x32xf32>
      %c0_27 = arith.constant 0 : index
      %c0_28 = arith.constant 0 : index
      %33 = vector.load %arg5[%c0_27, %c0_28] : memref<3x32xf32, #tpu.memory_space<vmem>>, vector<1x32xf32>
      %34 = vector.shape_cast %33 : vector<1x32xf32> to vector<32xf32>
      %35 = vector.shape_cast %34 : vector<32xf32> to vector<1x32xf32>
      %36 = vector.broadcast %35 : vector<1x32xf32> to vector<2x32xf32>
      %37 = arith.addf %32, %36 : vector<2x32xf32>
      %cst_29 = arith.constant 0.000000e+00 : f32
      %38 = vector.broadcast %cst_29 : f32 to vector<2x32xf32>
      %39 = arith.maximumf %37, %38 : vector<2x32xf32>
      %40 = vector.shape_cast %39 : vector<2x32xf32> to vector<2x1x32xf32>
      %c0_30 = arith.constant 0 : index
      %c0_31 = arith.constant 0 : index
      %c0_32 = arith.constant 0 : index
      %41 = vector.load %arg7[%c0_30, %c0_31, %c0_32] : memref<2x3x32xf32, #tpu.memory_space<vmem>>, vector<2x1x32xf32>
      tpu.vector_store %arg7[%c0_30, %c0_31, %c0_32], %40 {strides = array<i32>} : memref<2x3x32xf32, #tpu.memory_space<vmem>>, vector<2x1x32xf32>,
      %c1 = arith.constant 1 : index
      %c0_33 = arith.constant 0 : index
      %c0_34 = arith.constant 0 : index
      %42 = vector.load %arg4[%c1, %c0_33, %c0_34] : memref<3x32x32xf32, #tpu.memory_space<vmem>>, vector<1x32x32xf32>
      %43 = vector.shape_cast %42 : vector<1x32x32xf32> to vector<32x32xf32>
      %cst_35 = arith.constant dense<0.000000e+00> : vector<2x32xf32>
      %44 = tpu.matmul %39, %43, %cst_35 {dimension_numbers = #tpu.dot_dimension_numbers<[1], [0], [0], [1], [0, 0, 1, 1], [], []>} : vector<2x32xf32>, vector<32x32xf32>, vector<2x32xf32> -> vector<2x32xf32>
      %c1_36 = arith.constant 1 : index
      %c0_37 = arith.constant 0 : index
      %45 = vector.load %arg5[%c1_36, %c0_37] : memref<3x32xf32, #tpu.memory_space<vmem>>, vector<1x32xf32>
      %46 = vector.shape_cast %45 : vector<1x32xf32> to vector<32xf32>
      %47 = vector.shape_cast %46 : vector<32xf32> to vector<1x32xf32>
      %48 = vector.broadcast %47 : vector<1x32xf32> to vector<2x32xf32>
      %49 = arith.addf %44, %48 : vector<2x32xf32>
      %cst_38 = arith.constant 0.000000e+00 : f32
      %50 = vector.broadcast %cst_38 : f32 to vector<2x32xf32>
      %51 = arith.maximumf %49, %50 : vector<2x32xf32>
      %52 = vector.shape_cast %51 : vector<2x32xf32> to vector<2x1x32xf32>
      %c0_39 = arith.constant 0 : index
      %c1_40 = arith.constant 1 : index
      %c0_41 = arith.constant 0 : index
      %53 = vector.load %arg7[%c0_39, %c1_40, %c0_41] : memref<2x3x32xf32, #tpu.memory_space<vmem>>, vector<2x1x32xf32>
      tpu.vector_store %arg7[%c0_39, %c1_40, %c0_41], %52 {strides = array<i32>} : memref<2x3x32xf32, #tpu.memory_space<vmem>>, vector<2x1x32xf32>,
      %c2 = arith.constant 2 : index
      %c0_42 = arith.constant 0 : index
      %c0_43 = arith.constant 0 : index
      %54 = vector.load %arg4[%c2, %c0_42, %c0_43] : memref<3x32x32xf32, #tpu.memory_space<vmem>>, vector<1x32x32xf32>
      %55 = vector.shape_cast %54 : vector<1x32x32xf32> to vector<32x32xf32>
      %cst_44 = arith.constant dense<0.000000e+00> : vector<2x32xf32>
      %56 = tpu.matmul %51, %55, %cst_44 {dimension_numbers = #tpu.dot_dimension_numbers<[1], [0], [0], [1], [0, 0, 1, 1], [], []>} : vector<2x32xf32>, vector<32x32xf32>, vector<2x32xf32> -> vector<2x32xf32>
      %c2_45 = arith.constant 2 : index
      %c0_46 = arith.constant 0 : index
      %57 = vector.load %arg5[%c2_45, %c0_46] : memref<3x32xf32, #tpu.memory_space<vmem>>, vector<1x32xf32>
      %58 = vector.shape_cast %57 : vector<1x32xf32> to vector<32xf32>
      %59 = vector.shape_cast %58 : vector<32xf32> to vector<1x32xf32>
      %60 = vector.broadcast %59 : vector<1x32xf32> to vector<2x32xf32>
      %61 = arith.addf %56, %60 : vector<2x32xf32>
      %cst_47 = arith.constant 0.000000e+00 : f32
      %62 = vector.broadcast %cst_47 : f32 to vector<2x32xf32>
      %63 = arith.maximumf %61, %62 : vector<2x32xf32>
      %64 = vector.shape_cast %63 : vector<2x32xf32> to vector<2x1x32xf32>
      %c0_48 = arith.constant 0 : index
      %c2_49 = arith.constant 2 : index
      %c0_50 = arith.constant 0 : index
      %65 = vector.load %arg7[%c0_48, %c2_49, %c0_50] : memref<2x3x32xf32, #tpu.memory_space<vmem>>, vector<2x1x32xf32>
      tpu.vector_store %arg7[%c0_48, %c2_49, %c0_50], %64 {strides = array<i32>} : memref<2x3x32xf32, #tpu.memory_space<vmem>>, vector<2x1x32xf32>,
      %c0_51 = arith.constant 0 : index
      %c0_52 = arith.constant 0 : index
      %66 = vector.load %arg6[%c0_51, %c0_52] : memref<2x32xf32, #tpu.memory_space<vmem>>, vector<2x32xf32>
      tpu.vector_store %arg6[%c0_51, %c0_52], %63 {strides = array<i32>} : memref<2x32xf32, #tpu.memory_space<vmem>>, vector<2x32xf32>,
    } else {
    }
    return
  }
  func.func @transform_0(%arg0: i32, %arg1: i32) -> (i32, i32, i32) {
    %c0_i32 = arith.constant 0 : i32
    %c0_i32_0 = arith.constant 0 : i32
    return %arg0, %arg1, %c0_i32 : i32, i32, i32
  }
  func.func @transform_1(%arg0: i32, %arg1: i32) -> (i32, i32) {
    %c0_i32 = arith.constant 0 : i32
    return %arg0, %arg1 : i32, i32
  }
  func.func @transform_2(%arg0: i32, %arg1: i32) -> (i32, i32, i32) {
    %c0_i32 = arith.constant 0 : i32
    %c0_i32_0 = arith.constant 0 : i32
    %c0_i32_1 = arith.constant 0 : i32
    %c0_i32_2 = arith.constant 0 : i32
    return %c0_i32, %c0_i32_0, %c0_i32_1 : i32, i32, i32
  }
  func.func @transform_3(%arg0: i32, %arg1: i32) -> (i32, i32) {
    %c0_i32 = arith.constant 0 : i32
    %c0_i32_0 = arith.constant 0 : i32
    %c0_i32_1 = arith.constant 0 : i32
    return %c0_i32, %c0_i32_0 : i32, i32
  }
  func.func @transform_4(%arg0: i32, %arg1: i32) -> (i32, i32) {
    %c0_i32 = arith.constant 0 : i32
    %c0_i32_0 = arith.constant 0 : i32
    return %arg0, %c0_i32 : i32, i32
  }
  func.func @transform_5(%arg0: i32, %arg1: i32) -> (i32, i32, i32) {
    %c0_i32 = arith.constant 0 : i32
    %c0_i32_0 = arith.constant 0 : i32
    %c0_i32_1 = arith.constant 0 : i32
    return %arg0, %c0_i32, %c0_i32_0 : i32, i32, i32
  }
}

</mosaic_0001>

<bundles_post_ra>
// kernel: sequence_to_vector.1
= control target key start
LH: loop header
LB: loop body
LE: loop exit
PB: predicated region body
PF: predicated region fallthrough
CT: control target
= control target key end

     0   :  { %11 = vsyncpa [#allocation5], 0  ;;  %s768_s0 = inlined_call_operand.hbm [shape: f32[2,8,32], index: 0, kind: input, shape index: {}]   ;;  %s769_s1 = inlined_call_operand.vmem [shape: f32[2,8], index: 1, kind: input, shape index: {}]   ;;  %s770_s2 = inlined_call_operand.hbm [shape: f32[3,32,32], index: 2, kind: input, shape index: {}]   ;;  %s771_s3 = inlined_call_operand.vmem [shape: f32[3,32], index: 3, kind: input, shape index: {}]   ;;  %s772_s4 = inlined_call_operand.hbm [shape: f32[2,32], index: 4, kind: output, shape index: {0}]   ;;  %s773_s5 = inlined_call_operand.vmem [shape: f32[2,3,32], index: 5, kind: output, shape index: {1}]  }
   0x1   :  { %12 = vsyncpa [#allocation8], 0 }
   0x2   :  { %13 = vsyncpa [#allocation6], 0  ;;  %s633_s18 = smov [#allocation4]   ;;  %s561_s22 = scalar_lea.hbm %s768_s0, 256 }
   0x3   :  { %s19_s19 = sshll.u32 %s633_s18, 4  ;;  %p562_p0 = scmp.ne.s32.totalorder %s768_s0, %s561_s22  ;;  %s20_s19 = int_to_ptr.vmem [resolvable:$true] %s19_s19 }
   0x4   :  { %p565_p1 = scmp.lt.u32.totalorder %s561_s22, %s768_s0 }
   0x6   :  { %p567_p2 = pnand %p565_p1, %p562_p0 }
   0x8   :  { %570 = shalt.err (!%p567_p2)
}
   0x9   :  { %s571_s27 = scalar_lea.vmem %s20_s19, 256  ;;  %p576_p4 = scmp.lt.s32.totalorder %s20_s19, %s20_s19 }
   0xa   :  { %p572_p3 = scmp.ne.s32.totalorder %s20_s19, %s571_s27  ;;  %p577_p5 = scmp.lt.s32.totalorder %s571_s27, %s571_s27 }
   0xc   :  { %p578_p6 = por %p577_p5, %p576_p4 }
   0xe   :  { %p579_p7 = pnand %p578_p6, %p572_p3 }
  0x10   :  { %582 = shalt.err (!%p579_p7)
}
  0x11   :  { %s634_s28 = smov 128   ;;  %s635_s29 = smov 8  }
  0x12   :  { %25 = dma.hbm_to_vmem [thread:$0]  %s768_s0, 256, %s20_s19, [#allocation5], %s634_s28, %s634_s28, %s635_s29  }
  0x13   :  { %s636_s7 = smov [#allocation7]   ;;  %s583_s11 = scalar_lea.hbm %s770_s2, 1536 }
  0x14   :  { %s33_s8 = sshll.u32 %s636_s7, 4  ;;  %p584_p8 = scmp.ne.s32.totalorder %s770_s2, %s583_s11  ;;  %s34_s8 = int_to_ptr.vmem [resolvable:$true] %s33_s8 }
  0x15   :  { %p587_p9 = scmp.lt.u32.totalorder %s583_s11, %s770_s2 }
  0x17   :  { %p589_p10 = pnand %p587_p9, %p584_p8 }
  0x19   :  { %592 = shalt.err (!%p589_p10)
}
  0x1a   :  { %s593_s16 = scalar_lea.vmem %s34_s8, 1536  ;;  %p598_p12 = scmp.lt.s32.totalorder %s34_s8, %s34_s8 }
  0x1b   :  { %p594_p11 = scmp.ne.s32.totalorder %s34_s8, %s593_s16  ;;  %p599_p13 = scmp.lt.s32.totalorder %s593_s16, %s593_s16 }
  0x1d   :  { %p600_p0 = por %p599_p13, %p598_p12 }
  0x1f   :  { %p601_p1 = pnand %p600_p0, %p594_p11 }
  0x21   :  { %604 = shalt.err (!%p601_p1)
}
  0x22   :  { %39 = dma.hbm_to_vmem [thread:$0]  %s770_s2, 1536, %s34_s8, [#allocation8], %s634_s28, %s634_s28, %s635_s29  }
  0x23   :  { %627 = dma.done.wait [#allocation5], 256  }
  0x24   :  { %628 = vsyncadd [#allocation5], 4294967040 }
  0x25   :  { %629 = dma.done.wait [#allocation8], 1536  }
  0x26   :  { %630 = vsyncadd [#allocation8], 4294965760  ;;  %vm54_vm0 = vcmask 1024   ;;  %v637_v0 = vmov 0.0   ;;  %vm92_vm1 = vcmask 58368   ;;  %v59_v3 = vlaneseq  ;;  %v57_v10 = vld [vmem:[#allocation4 + $0x8] sm:$0xff] }
  0x27   :  { %55 = vst.msk [vmem:[#allocation3] sm:$0x3] %vm54_vm0, %v637_v0  ;;  %v58_v1 = vld [vmem:[%s769_s1] sm:$0x3]  ;;  %v638_v8 = vmov 0   ;;  %vm52_vm2 = vcmask 254976  }
  0x28   :  { %v93_v2 = vsel %vm92_vm1, %v58_v1, 0.0  ;;  %v702_v4 = vshrl.u32 %v59_v3, 7  ;;  %557 = vset.pattern.permute.xlu1 %v638_v8  ;;  %558 = vset.pattern.permute.xlu0 %v638_v8  ;;  %53 = vst.msk [vmem:[#allocation2] sm:$0x3] %vm52_vm2, %v637_v0  ;;  %vm75_vm3 = vcmask 261120   ;;  %v56_v19 = vld [vmem:[#allocation4] sm:$0xff] }
  0x29   :  { %94 = vadd.xlane.f32.xlu0 %v93_v2  ;;  %v123_v31 = vld [vmem:[#allocation7] sm:$0xff]  ;;  %v124_v32 = vld [vmem:[#allocation7 + $0x8] sm:$0xff]  ;;  %v125_v33 = vld [vmem:[#allocation7 + $0x10] sm:$0xff]  ;;  %v639_v35 = vmov 0.0|0.0   ;;  %vm640_vm4 = vmmov 0   ;;  %vm100_vm5 = vcmask 1041409  }
  0x2a   :  { %v68_v5 = vsub.s32 1, %v702_v4  ;;  %v61_v7 = vsub.s32 0, %v702_v4  ;;  %529 = vmatprep.subr.bf16.mxu0 %v639_v35  ;;  %v530_v36 = vpack.c.bf16 %v124_v32, %v123_v31  ;;  %v126_v37 = vld [vmem:[#allocation7 + $0x18] sm:$0xff]  ;;  %504 = vmatprep.mubr.msk.f32.mxu0 %vm640_vm4, %v637_v0  ;;  %v235_v45 = vld [vmem:[#allocation7 + $0x20] sm:$0xff]  ;;  %v236_v46 = vld [vmem:[#allocation7 + $0x28] sm:$0xff]  ;;  %vm231_vm6 = vcmask 253952  }
  0x2b   :  { %535 = vmatprep.subr.bf16.mxu1 %v639_v35  ;;  %515 = vmatprep.mubr.msk.f32.mxu1 %vm640_vm4, %v637_v0  ;;  %v533_v40 = vpack.c.bf16 %v126_v37, %v125_v33  ;;  %v536_v47 = vpack.c.bf16 %v236_v46, %v235_v45  ;;  %v237_v52 = vld [vmem:[#allocation7 + $0x30] sm:$0xff]  ;;  %v238_v53 = vld [vmem:[#allocation7 + $0x38] sm:$0xff]  ;;  %v345_v55 = vld [vmem:[#allocation7 + $0x40] sm:$0xff]  ;;  %v641_v58 = vmov 1966171168   ;;  %s642_s7 = smov [#allocation9]  }
  0x2c   :  { %v69_v6 = vrot.slane %v58_v1, %v68_v5  ;;  %v62_v9 = vrot.slane %v58_v1, %v61_v7  ;;  %531 = vmatpush3.bf16.msra.mxu0 %v530_v36  ;;  %v539_v54 = vpack.c.bf16 %v238_v53, %v237_v52  ;;  %v346_v56 = vld [vmem:[#allocation7 + $0x48] sm:$0xff]  ;;  %v208_v59 = vunpack.c.l.s4 %v641_v58  ;;  %v348_v8 = vld [vmem:[#allocation7 + $0x58] sm:$0xff]  ;;  %s461_s8 = sshll.u32 %s642_s7, 4  ;;  %s462_s8 = int_to_ptr.vmem [resolvable:$true] %s461_s8 }
  0x2d   :  { %532 = vmatprep.subr.bf16.mxu0 %v639_v35  ;;  %537 = vmatpush3.bf16.msra.mxu1 %v536_v47  ;;  %v542_v57 = vpack.c.bf16 %v346_v56, %v345_v55  ;;  %v475_v61 = vld [vmem:[%s771_s3] ss:$0 sm:$0xff]  ;;  %s605_s9 = scalar_lea.vmem %s462_s8, 32  ;;  %p610_p3 = scmp.lt.s32.totalorder %s462_s8, %s462_s8 }
  0x2e   :  { %71 = vbcast.lane.b32.xlu1 %v69_v6, 256  ;;  %v106_v15 = vld [vmem:[#allocation3] sm:$0x3]  ;;  %538 = vmatprep.subr.bf16.mxu1 %v639_v35  ;;  %v209_v60 = vunpack.c.0.s8 %v208_v59  ;;  %p606_p2 = scmp.ne.s32.totalorder %s462_s8, %s605_s9  ;;  %p611_p4 = scmp.lt.s32.totalorder %s605_s9, %s605_s9 }
  0x2f   :  { %v97_v42 = vld [vmem:[#allocation2] sm:$0x3] }
  0x30   :  { %534 = vmatpush3.bf16.msra.mxu0 %v533_v40  ;;  %v212_v63 = vsub.s32 %v209_v60, %v702_v4  ;;  %v347_v4 = vld [vmem:[#allocation7 + $0x50] sm:$0xff]  ;;  %p612_p5 = por %p611_p4, %p610_p3 }
  0x31   :  { %541 = vmatprep.subr.bf16.mxu0 %v639_v35  ;;  %540 = vmatpush3.bf16.msra.mxu1 %v539_v54 }
  0x32   :  { %p613_p6 = pnand %p612_p5, %p606_p2 }
  0x3f   :  { %64 = vbcast.lane.b32.xlu0 %v62_v9, 256  ;;  %v545_v9 = vpack.c.bf16 %v348_v8, %v347_v4 }
  0xa0   :  { %v72_v11 = vpop.permute.xlu1 %71 }
  0xa1   :  { %v74_v12 = vmul.f32 %v72_v11, %v57_v10  ;;  %v477_v10 = vld [vmem:[%s771_s3 + $0x1] ss:$0 sm:$0xff] }
  0xa3   :  { %v83_v13 = vsel %vm75_vm3, %v74_v12, 0.0 }
  0xa4   :  { %v84_v14 = vrot.slane %v83_v13, 4 }
  0xa6   :  { %v85_v17 = vadd.f32 %v84_v14, %v83_v13 }
  0xa8   :  { %v86_v20 = vrot.slane %v85_v17, 2 }
  0xaa   :  { %v87_v24 = vadd.f32 %v86_v20, %v85_v17 }
  0xac   :  { %v88_v29 = vrot.slane %v87_v24, 1 }
  0xae   :  { %v89_v38 = vadd.f32 %v88_v29, %v87_v24 }
  0xb6   :  { %v95_v16 = vpop.xlane.xlu0 %94 }
  0xb7   :  { %v107_v18 = vadd.f32 %v106_v15, %v95_v16 }
  0xb9   :  { %109 = vst.msk [vmem:[#allocation3] sm:$0x3] %vm54_vm0, %v107_v18 }
  0xba   :  { %v65_v21 = vpop.permute.xlu0 %64 }
  0xbb   :  { %v73_v22 = vmul.f32 %v65_v21, %v56_v19  ;;  %v479_v19 = vld [vmem:[%s771_s3 + $0x2] ss:$0 sm:$0xff] }
  0xbd   :  { %v76_v23 = vsel %vm75_vm3, %v73_v22, 0.0 }
  0xbe   :  { %v77_v25 = vrot.slane %v76_v23, 4 }
  0xc0   :  { %v113_v26 = vld [vmem:[#allocation3] sm:$0x3]  ;;  %v78_v27 = vadd.f32 %v77_v25, %v76_v23 }
  0xc1   :  { %v114_v28 = vmax.f32 %v113_v26, 1.0 }
  0xc2   :  { %v79_v30 = vrot.slane %v78_v27, 2 }
  0xc3   :  { %118 = vperm.xlu1 %557, %v114_v28  }
  0xc4   :  { %v80_v34 = vadd.f32 %v79_v30, %v78_v27 }
  0xc6   :  { %v81_v39 = vrot.slane %v80_v34, 1 }
  0xc8   :  { %v82_v41 = vadd.f32 %v81_v39, %v80_v34 }
  0xca   :  { %v101_v43 = vsel %vm100_vm5, %v89_v38, %v82_v41 }
  0xcb   :  { %v103_v44 = vadd.f32 %v101_v43, %v97_v42 }
  0xcd   :  { %105 = vst.msk [vmem:[#allocation2] sm:$0x3] %vm52_vm2, %v103_v44 }
  0xd4   :  { %v115_v50 = vld [vmem:[#allocation2] sm:$0x3] }
 0x142   :  { %v119_v48 = vpop.permute.xlu1 %118 }
 0x143   :  { %559 = vrcp.f32 %v119_v48 }
 0x14d   :  { %v560_v49 = vpop.eup %559 }
 0x14e   :  { %v122_v51 = vmul.f32 %v560_v49, %v115_v50 }
 0x150   :  { %505 = vmatmul.mubr.msk.f32.vlgmr.msra.gmra.mrb[0].mxu0 %vm75_vm3, %v122_v51 }
 0x151   :  { %526 = vmatprep.mubr.msk.f32.mxu0 %vm640_vm4, %v637_v0  ;;  %543 = vmatpush3.bf16.msra.mxu0 %v542_v57 }
 0x152   :  { %544 = vmatprep.subr.bf16.mxu0 %v639_v35 }
 0x155   :  { %546 = vmatpush3.bf16.msra.mxu0 %v545_v9 }
 0x223   :  { %v201_v62 = vpop.f32.mrb[0].mxu0 }
 0x224   :  { %v202_v0 = vadd.f32 %v475_v61, %v201_v62  ;;  %v506_v1 = vpop.f32.mrb[1].mxu0 }
 0x226   :  { %v205_v2 = vmax.f32 %v202_v0, 0.0 }
 0x228   :  { %v213_v3 = vrot.slane %v205_v2, %v212_v63  ;;  %516 = vmatmul.mubr.msk.f32.vlgmr.msra.gmra.mrb[0].mxu1 %vm75_vm3, %v205_v2 }
 0x22a   :  { %v214_v5 = vcombine.high %v213_v3, %v213_v3  ;;  %v221_v6 = vrot.slane %v213_v3, %v212_v63 }
 0x22c   :  { %v228_v7 = vrot.slane %v214_v5, %v212_v63  ;;  %232 = vst.msk [vmem:[%s773_s5] sm:$0x1] %vm231_vm6, %v221_v6 }
 0x22e   :  { %233 = vst.msk [vmem:[%s773_s5 + $0x4] sm:$0x1] %vm231_vm6, %v228_v7 }
 0x2fb   :  { %v312_v11 = vpop.f32.mrb[0].mxu1 }
 0x2fc   :  { %v313_v12 = vadd.f32 %v477_v10, %v312_v11  ;;  %v517_v13 = vpop.f32.mrb[1].mxu1 }
 0x2fe   :  { %v316_v14 = vmax.f32 %v313_v12, 0.0 }
 0x300   :  { %v324_v15 = vrot.slane %v316_v14, %v212_v63  ;;  %527 = vmatmul.mubr.msk.f32.vlgmr.msra.gmra.mrb[2].mxu0 %vm75_vm3, %v316_v14 }
 0x302   :  { %v325_v16 = vcombine.high %v324_v15, %v324_v15  ;;  %v332_v17 = vrot.slane %v324_v15, %v212_v63 }
 0x304   :  { %v339_v18 = vrot.slane %v325_v16, %v212_v63  ;;  %342 = vst.msk [vmem:[%s773_s5 + $0x1] sm:$0x1] %vm231_vm6, %v332_v17 }
 0x306   :  { %343 = vst.msk [vmem:[%s773_s5 + $0x5] sm:$0x1] %vm231_vm6, %v339_v18 }
 0x3d3   :  { %v422_v20 = vpop.f32.mrb[2].mxu0 }
 0x3d4   :  { %v423_v21 = vadd.f32 %v479_v19, %v422_v20  ;;  %v528_v22 = vpop.f32.mrb[3].mxu0 }
 0x3d6   :  { %v426_v23 = vmax.f32 %v423_v21, 0.0 }
 0x3d8   :  { %v434_v24 = vrot.slane %v426_v23, %v212_v63  ;;  %454 = vst.msk [vmem:[#allocation9] sm:$0x3] %vm52_vm2, %v426_v23 }
 0x3d9   :  { %616 = shalt.err (!%p613_p6)
}
 0x3da   :  { %s617_s3 = scalar_lea.hbm %s772_s4, 32 }
 0x3db   :  { %p618_p7 = scmp.ne.s32.totalorder %s772_s4, %s617_s3  ;;  %p621_p8 = scmp.lt.u32.totalorder %s617_s3, %s772_s4 }
 0x3dd   :  { %p623_p9 = pnand %p621_p8, %p618_p7 }
 0x3df   :  { %626 = shalt.err (!%p623_p9)
}
 0x3e0   :  { %464 = dma.vmem_to_hbm [thread:$0]  %s462_s8, 32, %s772_s4, [#allocation6]   ;;  %v435_v25 = vcombine.high %v434_v24, %v434_v24  ;;  %v442_v26 = vrot.slane %v434_v24, %v212_v63 }
 0x3e2   :  { %v449_v27 = vrot.slane %v435_v25, %v212_v63  ;;  %452 = vst.msk [vmem:[%s773_s5 + $0x2] sm:$0x1] %vm231_vm6, %v442_v26 }
 0x3e4   :  { %453 = vst.msk [vmem:[%s773_s5 + $0x6] sm:$0x1] %vm231_vm6, %v449_v27 }
 0x3e5   :  { %631 = dma.done.wait [#allocation6], 32  }
 0x3e6   :  { %632 = vsyncadd [#allocation6], 4294967264 }
 0x3e7   :  { %472 = vsyncpa [#allocation5], 1 }
 0x3e8   :  { %473 = vsyncpa [#allocation8], 1 }
 0x3e9   :  { %474 = vsyncpa [#allocation6], 1 }

</bundles_post_ra>
